<compile_context>
chip_gen: v6e
topology: v6e:2x2x1
jax: 0.10.0
libtpu: 0.0.40
codegen_flags: <defaults>
</compile_context>

<pallas_src>
import functools

import jax
import jax.numpy as jnp
from jax.experimental import pallas as pl
from jax.experimental.pallas import tpu as pltpu


_SQRT_HALF = 0.7071067811865476


def _erf_f32(z):
    """Abramowitz & Stegun 7.1.26 rational erf approximation, |err| <= 1.5e-7.

    Only mul/add/div/exp/select -> lowers cleanly in Mosaic; the single
    transcendental (exp) lands on the EUP slot rather than a long VALU-only
    erf polynomial.
    """
    p = 0.3275911
    a1, a2, a3, a4, a5 = (0.254829592, -0.284496736, 1.421413741,
                          -1.453152027, 1.061405429)
    az = jnp.abs(z)
    t = 1.0 / (1.0 + p * az)
    poly = t * (a1 + t * (a2 + t * (a3 + t * (a4 + t * a5))))
    e = poly * jnp.exp(-az * az)            # e = 1 - erf(|z|)
    return jnp.where(z >= 0.0, 1.0 - e, e - 1.0)


def _gelu(x, *, tanh_approx):
    if tanh_approx:
        # Cheaper (~6 VALU ops + tanh on EUP) but NOT bit-parity with PyTorch
        # nn.GELU() default (erf); opt-in only.
        return jax.nn.gelu(x, approximate=True)
    # Exact (erf) GELU, matching PyTorch nn.GELU() default.
    return 0.5 * x * (1.0 + _erf_f32(x * _SQRT_HALF))


# ---------------------------------------------------------------------------
# Pallas kernel: fused 2-layer channel MLP over a (C, ts) tile of tokens
# ---------------------------------------------------------------------------
def mlp_kernel(x_ref, w1_ref, b1_ref, w2_ref, b2_ref, o_ref, *, chunk, tanh_gelu):
    # x_ref: (C_in, ts)   w1_ref: (H, C_in)   b1_ref: (H, 1)
    # w2_ref: (C_out, H)  b2_ref: (C_out, 1)  o_ref: (C_out, ts)
    hidden = w1_ref.shape[0]
    c_out = w2_ref.shape[0]
    ts = x_ref.shape[-1]
    chunk = min(chunk, ts)

    w1 = w1_ref[...]
    w2 = w2_ref[...]
    # Hoisted lane-broadcasts of the bias columns (broadcast_in_dim is not
    # CSE'd by JAX; do it once, outside the chunk loop).
    b1b = jnp.broadcast_to(b1_ref[...].astype(jnp.float32), (hidden, chunk))
    b2b = jnp.broadcast_to(b2_ref[...].astype(jnp.float32), (c_out, chunk))

    def one_chunk(start, width):
        # Static start/width -> static Ref slices; `start` is always a
        # multiple of `chunk` (itself a multiple of 128 when S is tiled).
        x = x_ref[:, start:start + width]
        # MXU matmuls with f32 accumulation.  At these channel counts the MXU
        # is under-utilized (K = C_in / hidden << 128/256), but it still beats
        # VPU broadcast-FMAs for the K=hidden contraction and keeps the VALU
        # slot free for the GELU.
        h = jnp.dot(w1, x, preferred_element_type=jnp.float32) + b1b[:, :width]
        h = _gelu(h, tanh_approx=tanh_gelu)
        y = jnp.dot(w2, h, preferred_element_type=jnp.float32) + b2b[:, :width]
        o_ref[:, start:start + width] = y.astype(o_ref.dtype)

    # Lane-chunked loop: keeps the f32 (hidden, chunk) intermediate and GELU
    # temporaries inside the vreg file instead of spilling to VMEM.
    n_full, rem = divmod(ts, chunk)
    for c in range(n_full):                 # fully static unroll, static slices
        one_chunk(c * chunk, chunk)
    if rem:
        one_chunk(n_full * chunk, rem)


def mlp_channel(x_bcs, w1, b1, w2, b2, *, max_ts=16384, chunk=512, tanh_gelu=False):
    """Fused channel-MLP on x_bcs: [B, C_in, S] -> [B, C_out, S]."""
    b, c_in, s = x_bcs.shape
    hidden = w1.shape[0]
    c_out = w2.shape[0]

    # ---- spatial tile size -------------------------------------------------
    # Large lane-dense tiles amortize the ~0.35us/step pipeline overhead: use
    # the full spatial extent when it fits, else a big multiple of 128.
    if s <= max_ts:
        ts = s
    else:
        ts = max(128, (max_ts // 128) * 128)

    # v7x has 2 TensorCores: guarantee >= 2 parallel grid steps so both get
    # work (no-op when B >= 2 or S already tiles into several steps).
    if b * pl.cdiv(s, ts) < 2 and s >= 256:
        ts = ((pl.cdiv(s, 2) + 127) // 128) * 128

    grid = (b, pl.cdiv(s, ts))

    # ---- explicit per-step VMEM budget (portable across v5e/v6e/v7x) -------
    # double-buffered x/out tiles + resident (double-buffered) weights + a
    # rough allowance for the in-flight chunk intermediates.
    itemsize = jnp.dtype(x_bcs.dtype).itemsize
    est = (2 * (c_in + c_out) * ts * itemsize
           + 2 * 4 * (hidden * (c_in + 1) + c_out * (hidden + 1))
           + 4 * 4 * hidden * min(chunk, ts))
    vmem_limit = int(min(48 * 2**20, 4 * est)) if est > 8 * 2**20 else None

    kernel = functools.partial(mlp_kernel, chunk=chunk, tanh_gelu=tanh_gelu)

    return pl.pallas_call(
        kernel,
        out_shape=jax.ShapeDtypeStruct((b, c_out, s), x_bcs.dtype),
        grid_spec=pltpu.PrefetchScalarGridSpec(
            num_scalar_prefetch=0,
            grid=grid,
            in_specs=[
                # x tile: batch squeezed, channels full, spatial tiled (lanes).
                pl.BlockSpec((None, c_in, ts), lambda i, j: (i, 0, j)),
                pl.BlockSpec((hidden, c_in), lambda i, j: (0, 0)),   # W1 resident
                pl.BlockSpec((hidden, 1), lambda i, j: (0, 0)),      # b1 column
                pl.BlockSpec((c_out, hidden), lambda i, j: (0, 0)),  # W2 resident
                pl.BlockSpec((c_out, 1), lambda i, j: (0, 0)),       # b2 column
            ],
            out_specs=pl.BlockSpec((None, c_out, ts), lambda i, j: (i, 0, j)),
        ),
        compiler_params=pltpu.CompilerParams(
            dimension_semantics=("parallel", "parallel"),
            vmem_limit_bytes=vmem_limit,
        ),
    )(x_bcs, w1, b1, w2, b2)


# ---------------------------------------------------------------------------
# Module-level wrapper reproducing MLP.forward for mode='channel'
# ---------------------------------------------------------------------------
@functools.partial(jax.jit, static_argnames=("max_ts", "chunk", "tanh_gelu"))
def mlp_forward(x, w1, b1, w2, b2, *, max_ts=16384, chunk=512, tanh_gelu=False):
    """x: [B, C_in, nX, nY] -> [B, C_out, nX, nY].  Only pure reshapes outside
    the kernel (NCHW is already channel-major)."""
    b, c_in, nx, ny = x.shape
    c_out = w2.shape[0]
    x_flat = x.reshape(b, c_in, nx * ny)                 # [B, C_in, S]
    y_flat = mlp_channel(x_flat, w1, b1, w2, b2,
                         max_ts=max_ts, chunk=chunk, tanh_gelu=tanh_gelu)
    return y_flat.reshape(b, c_out, nx, ny)              # [B, C_out, nX, nY]


# ---------------------------------------------------------------------------
# Pure-JAX reference (for correctness check)
# ---------------------------------------------------------------------------
def mlp_reference(x, w1, b1, w2, b2):
    b, c_in, nx, ny = x.shape
    xf = x.reshape(b, c_in, -1)                          # [B, C_in, S]
    h = jnp.einsum("hc,bcs->bhs", w1, xf) + b1.reshape(1, -1, 1)
    h = jax.nn.gelu(h, approximate=False)
    y = jnp.einsum("oh,bhs->bos", w2, h) + b2.reshape(1, -1, 1)
    return y.reshape(b, w2.shape[0], nx, ny)


if __name__ == "__main__":
    # Module config: mode='channel', n_layers=2,
    # in_channels=4, hidden_channels=32, out_channels=4, dropout=0.0
    B, C_IN, NX, NY = 2, 4, 16, 16
    HIDDEN, C_OUT = 32, 4

    key = jax.random.PRNGKey(0)
    kx, k1, k2, k3, k4 = jax.random.split(key, 5)

    x = jax.random.normal(kx, (B, C_IN, NX, NY), dtype=jnp.float32)

    # Conv1d(k=1) params in PyTorch layout: weight [out, in], bias as [out, 1]
    # column (broadcasts along the lane/spatial axis in-kernel).
    bound1 = 1.0 / jnp.sqrt(C_IN)
    bound2 = 1.0 / jnp.sqrt(HIDDEN)
    w1 = jax.random.uniform(k1, (HIDDEN, C_IN), jnp.float32, -bound1, bound1)
    b1 = jax.random.uniform(k2, (HIDDEN, 1), jnp.float32, -bound1, bound1)
    w2 = jax.random.uniform(k3, (C_OUT, HIDDEN), jnp.float32, -bound2, bound2)
    b2 = jax.random.uniform(k4, (C_OUT, 1), jnp.float32, -bound2, bound2)

    # TODO(synk): dropout > 0 (training mode) is not implemented; module default
    # dropout=0.0 is an Identity so inference semantics are exact.

    out = jax.block_until_ready(mlp_forward(x, w1, b1, w2, b2))
    ref = mlp_reference(x, w1, b1, w2, b2)

    assert out.shape == (B, C_OUT, NX, NY), out.shape
    # Tolerance accounts for TPU default f32 matmul precision (bf16 MXU passes)
    # in either the kernel or the XLA reference; structural errors would be
    # orders of magnitude larger.
    max_err = float(jnp.max(jnp.abs(out - ref)))
    assert jnp.allclose(out, ref, atol=1e-2, rtol=1e-2), (
        f"mismatch vs reference, max|err|={max_err}")

    print("KERNEL_OK")
</pallas_src>

<mosaic_0001>
module attributes {stable_mosaic.version = 11 : i64} {
  func.func @mlp_kernel(%arg0: i32, %arg1: i32, %arg2: memref<1x4x256xf32, #tpu.memory_space<vmem>>, %arg3: memref<32x4xf32, #tpu.memory_space<vmem>>, %arg4: memref<32x1xf32, #tpu.memory_space<vmem>>, %arg5: memref<4x32xf32, #tpu.memory_space<vmem>>, %arg6: memref<4x1xf32, #tpu.memory_space<vmem>>, %arg7: memref<1x4x256xf32, #tpu.memory_space<vmem>>) attributes {dimension_semantics = [#tpu.dimension_semantics<parallel>, #tpu.dimension_semantics<parallel>], iteration_bounds = array<i64: 2, 1>, scalar_prefetch = 0 : i64, scratch_operands = 0 : i64, tpu.core_type = #tpu.core_type<tc>, window_params = [{transform_indices = @transform_0, window_bounds = array<i64: 1, 4, 256>}, {pipeline_mode = #tpu.pipeline_mode<synchronous>, transform_indices = @transform_1, window_bounds = array<i64: 32, 4>}, {pipeline_mode = #tpu.pipeline_mode<synchronous>, transform_indices = @transform_2, window_bounds = array<i64: 32, 1>}, {pipeline_mode = #tpu.pipeline_mode<synchronous>, transform_indices = @transform_3, window_bounds = array<i64: 4, 32>}, {pipeline_mode = #tpu.pipeline_mode<synchronous>, transform_indices = @transform_4, window_bounds = array<i64: 4, 1>}, {transform_indices = @transform_5, window_bounds = array<i64: 1, 4, 256>}]} {
    %c0 = arith.constant 0 : index
    %c0_0 = arith.constant 0 : index
    %0 = vector.load %arg3[%c0, %c0_0] : memref<32x4xf32, #tpu.memory_space<vmem>>, vector<32x4xf32>
    %c0_1 = arith.constant 0 : index
    %c0_2 = arith.constant 0 : index
    %1 = vector.load %arg5[%c0_1, %c0_2] : memref<4x32xf32, #tpu.memory_space<vmem>>, vector<4x32xf32>
    %c0_3 = arith.constant 0 : index
    %c0_4 = arith.constant 0 : index
    %2 = vector.load %arg4[%c0_3, %c0_4] : memref<32x1xf32, #tpu.memory_space<vmem>>, vector<32x1xf32>
    %3 = vector.shape_cast %2 : vector<32x1xf32> to vector<32x1xf32>
    %4 = vector.broadcast %3 : vector<32x1xf32> to vector<32x256xf32>
    %c0_5 = arith.constant 0 : index
    %c0_6 = arith.constant 0 : index
    %5 = vector.load %arg6[%c0_5, %c0_6] : memref<4x1xf32, #tpu.memory_space<vmem>>, vector<4x1xf32>
    %6 = vector.shape_cast %5 : vector<4x1xf32> to vector<4x1xf32>
    %7 = vector.broadcast %6 : vector<4x1xf32> to vector<4x256xf32>
    %c0_7 = arith.constant 0 : index
    %c0_8 = arith.constant 0 : index
    %c0_9 = arith.constant 0 : index
    %8 = vector.load %arg2[%c0_7, %c0_8, %c0_9] : memref<1x4x256xf32, #tpu.memory_space<vmem>>, vector<1x4x256xf32>
    %9 = vector.shape_cast %8 : vector<1x4x256xf32> to vector<4x256xf32>
    %cst = arith.constant dense<0.000000e+00> : vector<32x256xf32>
    %10 = tpu.matmul %0, %9, %cst {dimension_numbers = #tpu.dot_dimension_numbers<[1], [0], [0], [1], [0, 0, 1, 1], [], []>} : vector<32x4xf32>, vector<4x256xf32>, vector<32x256xf32> -> vector<32x256xf32>
    %11 = arith.addf %10, %4 : vector<32x256xf32>
    %cst_10 = arith.constant 5.000000e-01 : f32
    %12 = vector.broadcast %cst_10 : f32 to vector<32x256xf32>
    %13 = arith.mulf %12, %11 : vector<32x256xf32>
    %cst_11 = arith.constant 0.707106769 : f32
    %14 = vector.broadcast %cst_11 : f32 to vector<32x256xf32>
    %15 = arith.mulf %11, %14 : vector<32x256xf32>
    %16 = math.absf %15 : vector<32x256xf32>
    %cst_12 = arith.constant 0.327591091 : f32
    %17 = vector.broadcast %cst_12 : f32 to vector<32x256xf32>
    %18 = arith.mulf %17, %16 : vector<32x256xf32>
    %cst_13 = arith.constant 1.000000e+00 : f32
    %19 = vector.broadcast %cst_13 : f32 to vector<32x256xf32>
    %20 = arith.addf %19, %18 : vector<32x256xf32>
    %cst_14 = arith.constant 1.000000e+00 : f32
    %21 = vector.broadcast %cst_14 : f32 to vector<32x256xf32>
    %22 = arith.divf %21, %20 : vector<32x256xf32>
    %cst_15 = arith.constant 1.06140542 : f32
    %23 = vector.broadcast %cst_15 : f32 to vector<32x256xf32>
    %24 = arith.mulf %22, %23 : vector<32x256xf32>
    %cst_16 = arith.constant -1.45315206 : f32
    %25 = vector.broadcast %cst_16 : f32 to vector<32x256xf32>
    %26 = arith.addf %25, %24 : vector<32x256xf32>
    %27 = arith.mulf %22, %26 : vector<32x256xf32>
    %cst_17 = arith.constant 1.42141378 : f32
    %28 = vector.broadcast %cst_17 : f32 to vector<32x256xf32>
    %29 = arith.addf %28, %27 : vector<32x256xf32>
    %30 = arith.mulf %22, %29 : vector<32x256xf32>
    %cst_18 = arith.constant -0.284496725 : f32
    %31 = vector.broadcast %cst_18 : f32 to vector<32x256xf32>
    %32 = arith.addf %31, %30 : vector<32x256xf32>
    %33 = arith.mulf %22, %32 : vector<32x256xf32>
    %cst_19 = arith.constant 0.254829586 : f32
    %34 = vector.broadcast %cst_19 : f32 to vector<32x256xf32>
    %35 = arith.addf %34, %33 : vector<32x256xf32>
    %36 = arith.mulf %22, %35 : vector<32x256xf32>
    %cst_20 = arith.constant 0.000000e+00 : f32
    %37 = vector.broadcast %cst_20 : f32 to vector<32x256xf32>
    %38 = arith.subf %37, %16 : vector<32x256xf32>
    %39 = arith.mulf %38, %16 : vector<32x256xf32>
    %40 = math.exp %39 : vector<32x256xf32>
    %41 = arith.mulf %36, %40 : vector<32x256xf32>
    %cst_21 = arith.constant 0.000000e+00 : f32
    %42 = vector.broadcast %cst_21 : f32 to vector<32x256xf32>
    %43 = arith.cmpf oge, %15, %42 : vector<32x256xf32>
    %cst_22 = arith.constant 1.000000e+00 : f32
    %44 = vector.broadcast %cst_22 : f32 to vector<32x256xf32>
    %45 = arith.subf %44, %41 : vector<32x256xf32>
    %cst_23 = arith.constant 1.000000e+00 : f32
    %46 = vector.broadcast %cst_23 : f32 to vector<32x256xf32>
    %47 = arith.subf %41, %46 : vector<32x256xf32>
    %48 = arith.select %43, %45, %47 : vector<32x256xi1>, vector<32x256xf32>
    %cst_24 = arith.constant 1.000000e+00 : f32
    %49 = vector.broadcast %cst_24 : f32 to vector<32x256xf32>
    %50 = arith.addf %49, %48 : vector<32x256xf32>
    %51 = arith.mulf %13, %50 : vector<32x256xf32>
    %cst_25 = arith.constant dense<0.000000e+00> : vector<4x256xf32>
    %52 = tpu.matmul %1, %51, %cst_25 {dimension_numbers = #tpu.dot_dimension_numbers<[1], [0], [0], [1], [0, 0, 1, 1], [], []>} : vector<4x32xf32>, vector<32x256xf32>, vector<4x256xf32> -> vector<4x256xf32>
    %53 = arith.addf %52, %7 : vector<4x256xf32>
    %c0_26 = arith.constant 0 : index
    %c0_27 = arith.constant 0 : index
    %c0_28 = arith.constant 0 : index
    %54 = vector.load %arg7[%c0_26, %c0_27, %c0_28] : memref<1x4x256xf32, #tpu.memory_space<vmem>>, vector<1x4x256xf32>
    %55 = vector.shape_cast %54 : vector<1x4x256xf32> to vector<4x256xf32>
    %56 = vector.shape_cast %53 : vector<4x256xf32> to vector<1x4x256xf32>
    tpu.vector_store %arg7[%c0_26, %c0_27, %c0_28], %56 {strides = array<i32>} : memref<1x4x256xf32, #tpu.memory_space<vmem>>, vector<1x4x256xf32>,
    return
  }
  func.func @transform_0(%arg0: i32, %arg1: i32) -> (i32, i32, i32) {
    %c0_i32 = arith.constant 0 : i32
    %c0_i32_0 = arith.constant 0 : i32
    return %arg0, %c0_i32, %arg1 : i32, i32, i32
  }
  func.func @transform_1(%arg0: i32, %arg1: i32) -> (i32, i32) {
    %c0_i32 = arith.constant 0 : i32
    %c0_i32_0 = arith.constant 0 : i32
    %c0_i32_1 = arith.constant 0 : i32
    return %c0_i32, %c0_i32_0 : i32, i32
  }
  func.func @transform_2(%arg0: i32, %arg1: i32) -> (i32, i32) {
    %c0_i32 = arith.constant 0 : i32
    %c0_i32_0 = arith.constant 0 : i32
    %c0_i32_1 = arith.constant 0 : i32
    return %c0_i32, %c0_i32_0 : i32, i32
  }
  func.func @transform_3(%arg0: i32, %arg1: i32) -> (i32, i32) {
    %c0_i32 = arith.constant 0 : i32
    %c0_i32_0 = arith.constant 0 : i32
    %c0_i32_1 = arith.constant 0 : i32
    return %c0_i32, %c0_i32_0 : i32, i32
  }
  func.func @transform_4(%arg0: i32, %arg1: i32) -> (i32, i32) {
    %c0_i32 = arith.constant 0 : i32
    %c0_i32_0 = arith.constant 0 : i32
    %c0_i32_1 = arith.constant 0 : i32
    return %c0_i32, %c0_i32_0 : i32, i32
  }
  func.func @transform_5(%arg0: i32, %arg1: i32) -> (i32, i32, i32) {
    %c0_i32 = arith.constant 0 : i32
    %c0_i32_0 = arith.constant 0 : i32
    return %arg0, %c0_i32, %arg1 : i32, i32, i32
  }
}

</mosaic_0001>

<bundles_post_ra>
// kernel: mlp_forward.1
= control target key start
LH: loop header
LB: loop body
LE: loop exit
PB: predicated region body
PF: predicated region fallthrough
CT: control target
= control target key end

     0   :  { %s937_s18 = smov 0   ;;  %s939_s19 = smov 0   ;;  %s1147_s0 = inlined_call_operand.vmem [shape: f32[2,4,256], index: 0, kind: input, shape index: {}]   ;;  %s1148_s1 = inlined_call_operand.vmem [shape: f32[32,4], index: 1, kind: input, shape index: {}]   ;;  %s1149_s2 = inlined_call_operand.vmem [shape: f32[32,1], index: 2, kind: input, shape index: {}]   ;;  %s1150_s3 = inlined_call_operand.vmem [shape: f32[4,32], index: 3, kind: input, shape index: {}]   ;;  %s1151_s4 = inlined_call_operand.vmem [shape: f32[4,1], index: 4, kind: input, shape index: {}]   ;;  %s1152_s5 = inlined_call_operand.vmem [shape: f32[2,4,256], index: 5, kind: output, shape index: {}]  }
   0x1   :  { %s941_s20 = smov 0  }
   0x2 LB: > { %s27_s21 = sadd.s32 1, %s899_s19  ;;  %p796_p0 = scmp.ge.s32.totalorder %s903_s20, 1  ;;  %s903_s20 = sphi %s941_s20, %s15_s20   ;;  %s899_s19 = sphi %s939_s19, %s1154_s19   ;;  %s895_s18 = sphi %s937_s18, %s1153_s18  }
   0x3   : > { %p29_p1 = scmp.ge.s32.totalorder %s27_s21, 2  ;;  %p208_p2 = scmp.lt.s32.totalorder %s903_s20, 3 }
   0x5   : > { %s1156_s21 = smov (%p29_p1, %s27_s21), 0  ;;  %p209_p3 = pnand %p796_p0, %p208_p2 }
   0x6   : > { %p245_p4 = scmp.lt.s32.totalorder (!%p209_p3), %s895_s18, 1 }
   0x7   : > { %212 = sbr.rel (%p209_p3) target bundleno = 487 (0x1e7), region = 40 }
   0xc   : > { %v905_v0 = vmov 0.0   ;;  %v270_v1 = vld [vmem:[%s1149_s2 + $0x8] sm:$0xff]  ;;  %s1158_s18 = smov (!%p245_p4, %s895_s18), 1  ;;  %v906_v2 = vmov 0   ;;  %v272_v3 = vld [vmem:[%s1149_s2 + $0x18] sm:$0xff]  ;;  %v269_v4 = vld [vmem:[%s1149_s2] sm:$0xff] }
   0xd   : > { %384 = vmatprep.mubr.f32.mxu0 %v905_v0  ;;  %693 = vmatprep.mubr.f32.mxu1 %v905_v0  ;;  %s818_s26 = sshll.u32 %s1158_s18, 3  ;;  %v271_v5 = vld [vmem:[%s1149_s2 + $0x10] sm:$0xff]  ;;  %vm315_vm0 = vcmask 1043456   ;;  %v264_v8 = vld [vmem:[%s1148_s1] sm:$0xff]  ;;  %vm302_vm1 = vcmask 31744   ;;  %v265_v10 = vld [vmem:[%s1148_s1 + $0x8] sm:$0xff] }
   0xe   : > { %847 = vset.pattern.permute.xlu1 %v906_v2  ;;  %846 = vset.pattern.permute.xlu0 %v906_v2  ;;  %s252_s8 = scalar_lea.vmem %s1147_s0, %s818_s26  ;;  %v293_v9 = vld [vmem:[%s1151_s4] sm:$0xf]  ;;  %v266_v11 = vld [vmem:[%s1148_s1 + $0x10] sm:$0xff]  ;;  %v267_v12 = vld [vmem:[%s1148_s1 + $0x18] sm:$0xff]  ;;  %vm625_vm10 = vcmask 261120   ;;  %s262_s28 = scalar_lea.vmem %s1152_s5, %s818_s26 }
   0xf   : > { %280 = vperm.xlu1 %847, %v270_v1   ;;  %290 = vperm.xlu0 %846, %v272_v3   ;;  %v299_v6 = vld [vmem:[%s252_s8] sm:$0xff] }
  0x10   : > { %v301_v7 = vcombine.high %v299_v6, %v299_v6 }
  0x12   : > { %801 = vmatprep.subr.msk.mxu0 %vm315_vm0, %v301_v7 }
  0x13   : > { %275 = vperm.xlu1 %847, %v269_v4   ;;  %285 = vperm.xlu0 %846, %v271_v5  }
  0x14   : > { %802 = vmatpush1.msk.msra.mxu0 %vm315_vm0, %v299_v6 }
  0x15   : > { %803 = vmatmul.mubr.msk.f32.vlgmr.msra.gmra.mxu0 %vm302_vm1, %v264_v8 }
  0x16   : > { %390 = vmatprep.mubr.f32.mxu0 %v905_v0 }
  0x17   : > { %296 = vperm.xlu0 %846, %v293_v9  }
  0x19   : > { %804 = vmatmul.mubr.msk.f32.gmra.mxu0 %vm302_vm1, %v265_v10 }
  0x1a   : > { %396 = vmatprep.mubr.f32.mxu0 %v905_v0 }
  0x1d   : > { %805 = vmatmul.mubr.msk.f32.gmra.mxu0 %vm302_vm1, %v266_v11 }
  0x1e   : > { %402 = vmatprep.mubr.f32.mxu0 %v905_v0 }
  0x21   : > { %806 = vmatmul.mubr.msk.f32.gmra.mxu0 %vm302_vm1, %v267_v12 }
  0x8a   : > { %v281_v13 = vpop.permute.xlu1 %280  ;;  %v291_v20 = vpop.permute.xlu0 %290 }
  0x8e   : > { %v276_v14 = vpop.permute.xlu1 %275  ;;  %v286_v35 = vpop.permute.xlu0 %285 }
  0xd5   : > { %v386_v15 = vpop.f32.mrf.mxu0 }
  0xd6   : > { %v990_v16 = vadd.f32 %v386_v15, %v276_v14 }
  0xd7   : > { %v388_v17 = vpop.f32.mrf.mxu0 }
  0xd8   : > { %v993_v18 = vmul.f32 0.70710677, %v990_v16  ;;  %v995_v19 = vadd.f32 %v388_v17, %v276_v14 }
  0xd9   : > { %v392_v21 = vpop.f32.mrf.mxu0 }
  0xda   : > { %v998_v22 = vand.u32 2147483647, %v993_v18  ;;  %v1001_v23 = vmul.f32 0.70710677, %v995_v19  ;;  %v1003_v24 = vadd.f32 %v392_v21, %v281_v13  ;;  %vm577_vm9 = vcmp.ge.f32.partialorder %v993_v18, 0.0 }
  0xdb   : > { %v394_v25 = vpop.f32.mrf.mxu0 }
  0xdc   : > { %v433_v26 = vmul.f32 0.3275911, %v998_v22  ;;  %v426_v27 = vand.u32 2147483647, %v1001_v23  ;;  %v1008_v28 = vmul.f32 0.70710677, %v1003_v24  ;;  %v1010_v29 = vadd.f32 %v394_v25, %v281_v13 }
  0xdd   : > { %v398_v30 = vpop.f32.mrf.mxu0  ;;  %v537_v7 = vsub.f32 0.0, %v998_v22  ;;  %vm578_vm4 = vcmp.ge.f32.partialorder %v1001_v23, 0.0 }
  0xde   : > { %v441_v31 = vadd.f32 1.0, %v433_v26  ;;  %v434_v32 = vmul.f32 0.3275911, %v426_v27  ;;  %v1013_v33 = vand.u32 2147483647, %v1008_v28  ;;  %v1020_v41 = vadd.f32 %v398_v30, %v286_v35 }
  0xdf   : > { %v1016_v34 = vmul.f32 0.70710677, %v1010_v29  ;;  %v400_v36 = vpop.f32.mrf.mxu0  ;;  %v538_v2 = vsub.f32 0.0, %v426_v27  ;;  %v545_v21 = vmul.f32 %v537_v7, %v998_v22  ;;  %vm579_vm8 = vcmp.ge.f32.partialorder %v1008_v28, 0.0 }
  0xe0   : > { %849 = vrcp.f32 %v441_v31  ;;  %v442_v37 = vadd.f32 1.0, %v434_v32  ;;  %v435_v38 = vmul.f32 0.3275911, %v1013_v33  ;;  %v1022_v42 = vadd.f32 %v400_v36, %v286_v35 }
  0xe1   : > { %v428_v39 = vand.u32 2147483647, %v1016_v34  ;;  %v404_v40 = vpop.f32.mrf.mxu0  ;;  %v1025_v45 = vmul.f32 0.70710677, %v1020_v41  ;;  %v546_v12 = vmul.f32 %v538_v2, %v426_v27  ;;  %v539_v25 = vsub.f32 0.0, %v1013_v33 }
  0xe2   : > { %851 = vrcp.f32 %v442_v37  ;;  %v443_v43 = vadd.f32 1.0, %v435_v38  ;;  %v1029_v49 = vmul.f32 0.70710677, %v1022_v42  ;;  %v1031_v50 = vadd.f32 %v404_v40, %v291_v20 }
  0xe3   : > { %v436_v44 = vmul.f32 0.3275911, %v428_v39  ;;  %v406_v46 = vpop.f32.mrf.mxu0  ;;  %v429_v48 = vand.u32 2147483647, %v1025_v45  ;;  %v540_v8 = vsub.f32 0.0, %v428_v39  ;;  %v547_v22 = vmul.f32 %v539_v25, %v1013_v33 }
  0xe4   : > { %853 = vrcp.f32 %v443_v43  ;;  %v1033_v51 = vadd.f32 %v406_v46, %v291_v20  ;;  %v430_v53 = vand.u32 2147483647, %v1029_v49  ;;  %v1037_v54 = vmul.f32 0.70710677, %v1031_v50 }
  0xe5   : > { %v444_v47 = vadd.f32 1.0, %v436_v44  ;;  %v437_v52 = vmul.f32 0.3275911, %v429_v48  ;;  %v541_v13 = vsub.f32 0.0, %v429_v48  ;;  %v548_v30 = vmul.f32 %v540_v8, %v428_v39 }
  0xe6   : > { %v1040_v56 = vmul.f32 0.70710677, %v1033_v51  ;;  %v438_v57 = vmul.f32 0.3275911, %v430_v53  ;;  %v431_v58 = vand.u32 2147483647, %v1037_v54 }
  0xe7   : > { %855 = vrcp.f32 %v444_v47  ;;  %v445_v55 = vadd.f32 1.0, %v437_v52  ;;  %v542_v15 = vsub.f32 0.0, %v430_v53  ;;  %v555_v35 = vmul.f32 1.442695, %v546_v12 }
  0xe8   : > { %v432_v59 = vand.u32 2147483647, %v1040_v56  ;;  %v446_v61 = vadd.f32 1.0, %v438_v57  ;;  %v439_v62 = vmul.f32 0.3275911, %v431_v58  ;;  %v543_v31 = vsub.f32 0.0, %v431_v58 }
  0xe9   : > { %857 = vrcp.f32 %v445_v55  ;;  %v549_v36 = vmul.f32 %v541_v13, %v429_v48  ;;  %v550_v40 = vmul.f32 %v542_v15, %v430_v53  ;;  %v553_v52 = vmul.f32 1.442695, %v545_v21 }
  0xea   : > { %v440_v63 = vmul.f32 0.3275911, %v432_v59  ;;  %859 = vrcp.f32 %v446_v61  ;;  %v447_v0 = vadd.f32 1.0, %v439_v62  ;;  %v544_v46 = vsub.f32 0.0, %v432_v59 }
  0xeb   : > { %v559_v55 = vmul.f32 1.442695, %v548_v30  ;;  %v551_v57 = vmul.f32 %v543_v31, %v431_v58  ;;  %v561_v48 = vmul.f32 1.442695, %v549_v36  ;;  %v563_v53 = vmul.f32 1.442695, %v550_v40 }
  0xec   : > { %v448_v3 = vadd.f32 1.0, %v440_v63  ;;  %861 = vrcp.f32 %v447_v0  ;;  %vm580_vm2 = vcmp.ge.f32.partialorder %v1016_v34, 0.0  ;;  %vm581_vm3 = vcmp.ge.f32.partialorder %v1025_v45, 0.0 }
  0xed   : > { %v1044_v60 = vpop.eup %849  ;;  %vm582_vm5 = vcmp.ge.f32.partialorder %v1029_v49, 0.0  ;;  %vm583_vm6 = vcmp.ge.f32.partialorder %v1037_v54, 0.0  ;;  %vm584_vm7 = vcmp.ge.f32.partialorder %v1040_v56, 0.0  ;;  %v416_v54 = vmul.f32 0.5, %v1033_v51 }
  0xee   : > { %v465_v4 = vmul.f32 1.0614054, %v1044_v60  ;;  %863 = vrcp.f32 %v448_v3  ;;  %v415_v56 = vmul.f32 0.5, %v1031_v50  ;;  %v414_v28 = vmul.f32 0.5, %v1022_v42 }
  0xef   : > { %v1046_v1 = vpop.eup %851  ;;  %865 = vpow2.f32 %v555_v35  ;;  %v413_v34 = vmul.f32 0.5, %v1020_v41  ;;  %v411_v50 = vmul.f32 0.5, %v1003_v24  ;;  %v268_v24 = vld [vmem:[%s1150_s3] sm:$0xf] }
  0xf0   : > { %v466_v5 = vmul.f32 1.0614054, %v1046_v1  ;;  %v473_v11 = vadd.f32 -1.4531521, %v465_v4  ;;  %v557_v4 = vmul.f32 1.442695, %v547_v22  ;;  %867 = vpow2.f32 %v559_v55 }
  0xf1   : > { %v1050_v6 = vpop.eup %853  ;;  %869 = vpow2.f32 %v561_v48 }
  0xf2   : > { %v467_v9 = vmul.f32 1.0614054, %v1050_v6  ;;  %v474_v10 = vadd.f32 -1.4531521, %v466_v5  ;;  %v481_v27 = vmul.f32 %v1044_v60, %v473_v11  ;;  %v552_v5 = vmul.f32 %v544_v46, %v432_v59 }
  0xf3   : > { %871 = vpow2.f32 %v563_v53 }
  0xf4   : > { %v1054_v14 = vpop.eup %855  ;;  %v475_v17 = vadd.f32 -1.4531521, %v467_v9  ;;  %v482_v20 = vmul.f32 %v1046_v1, %v474_v10  ;;  %v489_v61 = vadd.f32 1.4214138, %v481_v27  ;;  %v565_v9 = vmul.f32 1.442695, %v551_v57 }
  0xf5   : > { %v468_v26 = vmul.f32 1.0614054, %v1054_v14  ;;  %v567_v25 = vmul.f32 1.442695, %v552_v5  ;;  %873 = vpow2.f32 %v557_v4 }
  0xf6   : > { %v483_v32 = vmul.f32 %v1050_v6, %v475_v17  ;;  %v1062_v38 = vpop.eup %857  ;;  %v490_v44 = vadd.f32 1.4214138, %v482_v20  ;;  %v497_v11 = vmul.f32 %v1044_v60, %v489_v61  ;;  %875 = vpow2.f32 %v565_v9 }
  0xf7   : > { %v476_v37 = vadd.f32 -1.4531521, %v468_v26  ;;  %v469_v47 = vmul.f32 1.0614054, %v1062_v38  ;;  %v1067_v62 = vpop.eup %859  ;;  %877 = vpow2.f32 %v553_v52 }
  0xf8   : > { %v491_v43 = vadd.f32 1.4214138, %v483_v32  ;;  %v470_v2 = vmul.f32 1.0614054, %v1067_v62  ;;  %v498_v3 = vmul.f32 %v1046_v1, %v490_v44  ;;  %v505_v35 = vadd.f32 -0.28449672, %v497_v11 }
  0xf9   : > { %v484_v39 = vmul.f32 %v1054_v14, %v476_v37  ;;  %v477_v63 = vadd.f32 -1.4531521, %v469_v47  ;;  %v1074_v8 = vpop.eup %861  ;;  %879 = vpow2.f32 %v567_v25 }
  0xfa   : > { %v499_v33 = vmul.f32 %v1050_v6, %v491_v43  ;;  %v478_v10 = vadd.f32 -1.4531521, %v470_v2  ;;  %v471_v12 = vmul.f32 1.0614054, %v1074_v8  ;;  %v506_v21 = vadd.f32 -0.28449672, %v498_v3 }
  0xfb   : > { %v492_v0 = vadd.f32 1.4214138, %v484_v39  ;;  %v485_v7 = vmul.f32 %v1062_v38, %v477_v63  ;;  %v1078_v17 = vpop.eup %863  ;;  %v513_v61 = vmul.f32 %v1044_v60, %v505_v35 }
  0xfc   : > { %v486_v59 = vmul.f32 %v1067_v62, %v478_v10  ;;  %v507_v20 = vadd.f32 -0.28449672, %v499_v33  ;;  %v472_v26 = vmul.f32 1.0614054, %v1078_v17  ;;  %v479_v30 = vadd.f32 -1.4531521, %v471_v12 }
  0xfd   : > { %v500_v58 = vmul.f32 %v1054_v14, %v492_v0  ;;  %v493_v13 = vadd.f32 1.4214138, %v485_v7  ;;  %v514_v22 = vmul.f32 %v1046_v1, %v506_v21  ;;  %v866_v0 = vpop.eup %865  ;;  %v521_v9 = vadd.f32 0.2548296, %v513_v61 }
  0xfe   : > { %v494_v32 = vadd.f32 1.4214138, %v486_v59  ;;  %v480_v36 = vadd.f32 -1.4531521, %v472_v26  ;;  %v487_v37 = vmul.f32 %v1074_v8, %v479_v30  ;;  %v515_v44 = vmul.f32 %v1050_v6, %v507_v20  ;;  %v868_v10 = vpop.eup %867 }
  0xff   : > { %v508_v15 = vadd.f32 -0.28449672, %v500_v58  ;;  %v501_v31 = vmul.f32 %v1062_v38, %v493_v13  ;;  %v522_v33 = vadd.f32 0.2548296, %v514_v22  ;;  %v870_v13 = vpop.eup %869 }
 0x100   : > { %v502_v43 = vmul.f32 %v1067_v62, %v494_v32  ;;  %v488_v46 = vmul.f32 %v1078_v17, %v480_v36  ;;  %v495_v47 = vadd.f32 1.4214138, %v487_v37  ;;  %v523_v2 = vadd.f32 0.2548296, %v515_v44  ;;  %v872_v21 = vpop.eup %871 }
 0x101   : > { %v516_v27 = vmul.f32 %v1054_v14, %v508_v15  ;;  %v509_v40 = vadd.f32 -0.28449672, %v501_v31  ;;  %v530_v20 = vmul.f32 %v1046_v1, %v522_v33 }
 0x102   : > { %v510_v55 = vadd.f32 -0.28449672, %v502_v43  ;;  %v496_v48 = vadd.f32 1.4214138, %v488_v46  ;;  %v503_v63 = vmul.f32 %v1074_v8, %v495_v47  ;;  %v531_v59 = vmul.f32 %v1050_v6, %v523_v2  ;;  %v874_v32 = vpop.eup %873 }
 0x103   : > { %v517_v39 = vmul.f32 %v1062_v38, %v509_v40  ;;  %v524_v57 = vadd.f32 0.2548296, %v516_v27  ;;  %v876_v6 = vpop.eup %875  ;;  %v570_v35 = vmul.f32 %v866_v0, %v530_v20 }
 0x104   : > { %v518_v53 = vmul.f32 %v1067_v62, %v510_v55  ;;  %v504_v3 = vmul.f32 %v1078_v17, %v496_v48  ;;  %v511_v4 = vadd.f32 -0.28449672, %v503_v63  ;;  %v571_v1 = vmul.f32 %v874_v32, %v531_v59  ;;  %v878_v36 = vpop.eup %877 }
 0x105   : > { %v525_v52 = vadd.f32 0.2548296, %v517_v39  ;;  %v532_v58 = vmul.f32 %v1054_v14, %v524_v57  ;;  %v529_v14 = vmul.f32 %v1044_v60, %v521_v9 }
 0x106   : > { %v526_v5 = vadd.f32 0.2548296, %v518_v53  ;;  %v512_v11 = vadd.f32 -0.28449672, %v504_v3  ;;  %v519_v12 = vmul.f32 %v1074_v8, %v511_v4  ;;  %v880_v44 = vpop.eup %879  ;;  %v587_v48 = vsub.f32 1.0, %v571_v1 }
 0x107   : > { %v533_v7 = vmul.f32 %v1062_v38, %v525_v52  ;;  %v572_v31 = vmul.f32 %v868_v10, %v532_v58  ;;  %v809_v63 = vadd.f32 -1.0, %v571_v1  ;;  %v586_v52 = vsub.f32 1.0, %v570_v35 }
 0x108   : > { %v534_v15 = vmul.f32 %v1067_v62, %v526_v5  ;;  %v520_v25 = vmul.f32 %v1078_v17, %v512_v11  ;;  %v527_v26 = vadd.f32 0.2548296, %v519_v12  ;;  %v808_v53 = vadd.f32 -1.0, %v570_v35 }
 0x109   : > { %v573_v38 = vmul.f32 %v870_v13, %v533_v7  ;;  %v588_v47 = vsub.f32 1.0, %v572_v31  ;;  %v810_v61 = vadd.f32 -1.0, %v572_v31  ;;  %v603_v49 = vsel %vm579_vm8, %v587_v48, %v809_v63 }
 0x10a   : > { %v574_v30 = vmul.f32 %v872_v21, %v534_v15  ;;  %v528_v27 = vadd.f32 0.2548296, %v520_v25  ;;  %v535_v62 = vmul.f32 %v1074_v8, %v527_v26  ;;  %v569_v8 = vmul.f32 %v878_v36, %v529_v14  ;;  %v297_v14 = vpop.permute.xlu0 %296 }
 0x10b   : > { %v589_v22 = vsub.f32 1.0, %v573_v38  ;;  %v811_v46 = vadd.f32 -1.0, %v573_v38  ;;  %v604_v9 = vsel %vm580_vm2, %v588_v47, %v810_v61  ;;  %v602_v12 = vsel %vm578_vm4, %v586_v52, %v808_v53 }
 0x10c   : > { %v536_v60 = vmul.f32 %v1078_v17, %v528_v27  ;;  %v575_v37 = vmul.f32 %v876_v6, %v535_v62  ;;  %v590_v40 = vsub.f32 1.0, %v574_v30  ;;  %v812_v43 = vadd.f32 -1.0, %v574_v30 }
 0x10d   : > { %v605_v3 = vsel %vm581_vm3, %v589_v22, %v811_v46  ;;  %v585_v4 = vsub.f32 1.0, %v569_v8  ;;  %v807_v5 = vadd.f32 -1.0, %v569_v8  ;;  %v612_v15 = vadd.f32 1.0, %v604_v9 }
 0x10e   : > { %v576_v39 = vmul.f32 %v880_v44, %v536_v60  ;;  %v591_v55 = vsub.f32 1.0, %v575_v37  ;;  %v813_v57 = vadd.f32 -1.0, %v575_v37  ;;  %v606_v33 = vsel %vm582_vm5, %v590_v40, %v812_v43 }
 0x10f   : > { %v614_v11 = vadd.f32 1.0, %v606_v33  ;;  %v613_v45 = vadd.f32 1.0, %v605_v3  ;;  %v601_v59 = vsel %vm577_vm9, %v585_v4, %v807_v5  ;;  %v611_v51 = vadd.f32 1.0, %v603_v49 }
 0x110   : > { %v592_v0 = vsub.f32 1.0, %v576_v39  ;;  %v814_v2 = vadd.f32 -1.0, %v576_v39  ;;  %v607_v17 = vsel %vm583_vm6, %v591_v55, %v813_v57  ;;  %v412_v21 = vmul.f32 0.5, %v1010_v29 }
 0x111   : > { %v615_v58 = vadd.f32 1.0, %v607_v17  ;;  %v622_v25 = vmul.f32 %v614_v11, %v414_v28  ;;  %v610_v18 = vadd.f32 1.0, %v602_v12  ;;  %v621_v26 = vmul.f32 %v613_v45, %v413_v34 }
 0x112   : > { %v608_v7 = vsel %vm584_vm7, %v592_v0, %v814_v2  ;;  %v609_v23 = vadd.f32 1.0, %v601_v59  ;;  %v410_v30 = vmul.f32 0.5, %v995_v19  ;;  %v620_v42 = vmul.f32 %v612_v15, %v412_v21 }
 0x113   : > { %v616_v10 = vadd.f32 1.0, %v608_v7  ;;  %v623_v20 = vmul.f32 %v615_v58, %v415_v56  ;;  %v409_v38 = vmul.f32 0.5, %v990_v16  ;;  %v619_v41 = vmul.f32 %v611_v51, %v411_v50 }
 0x114   : > { %v618_v31 = vmul.f32 %v610_v18, %v410_v30 }
 0x115   : > { %v624_v13 = vmul.f32 %v616_v10, %v416_v54  ;;  %v617_v29 = vmul.f32 %v609_v23, %v409_v38 }
 0x117   : > { %653 = vmatprep.subr.mxu1 %v624_v13 }
 0x118   : > { %654 = vmatpush1.msra.mxu1 %v623_v20 }
 0x119   : > { %655 = vmatprep.subr.mxu1 %v622_v25 }
 0x11a   : > { %656 = vmatpush1.msra.mxu1 %v621_v26 }
 0x11b   : > { %657 = vmatprep.subr.mxu1 %v620_v42 }
 0x11c   : > { %658 = vmatpush1.msra.mxu1 %v619_v41 }
 0x11d   : > { %659 = vmatprep.subr.mxu1 %v618_v31 }
 0x11e   : > { %660 = vmatpush1.msra.mxu1 %v617_v29 }
 0x11f   : > { %815 = vmatmul.mubr.msk.f32.vlgmr.msra.gmra.mxu1 %vm625_vm10, %v268_v24 }
 0x1df   : > { %v695_v19 = vpop.f32.mrf.mxu1 }
 0x1e0   : > { %v696_v27 = vadd.f32 %v695_v19, %v297_v14 }
 0x1e1   : > { %v697_v32 = vpop.f32.mrf.mxu1 }
 0x1e2   : > { %v698_v16 = vadd.f32 %v697_v32, %v297_v14 }
 0x1e4   : > { %v702_v62 = vcombine.low %v696_v27, %v698_v16 }
 0x1e6   : > { %704 = vst [vmem:[%s262_s28] sm:$0xff] %v702_v62 }
 0x1e7 PF: > { %s15_s20 = sadd.s32 1, %s903_s20   ;;  %s1153_s18 = smov %s899_s19 }
 0x1e8   : > { %p12_p5 = scmp.ge.s32.totalorder %s15_s20, 4   ;;  %s1154_s19 = smov %s1156_s21 }
 0x1ea   :  { %14 = sbr.rel (!%p12_p5) target bundleno = 2 (0x2), region = 70 }

</bundles_post_ra>
